<compile_context>
chip_gen: v7x
topology: tpu7x:2x2x1
jax: 0.10.0
libtpu: 0.0.40
codegen_flags: <defaults>
</compile_context>

<pallas_src>
import functools

import jax
import jax.numpy as jnp
from jax import lax
from jax.experimental import pallas as pl
from jax.experimental.pallas import tpu as pltpu


def _visual_model_kernel(patches_ref, wconv_ref, bconv_ref, wfc_ref, bfc_ref,
                         out_ref, *, inv_hw):
    # patches_ref: (H*W, KH*KW*C_in) bf16 — one sample's im2col rows
    #              (batch dim squeezed by the BlockSpec).
    # conv (im2col matmul) on the MXU, f32 accumulation.
    conv = jnp.dot(patches_ref[...], wconv_ref[...],
                   preferred_element_type=jnp.float32)            # (HW, C_feat) f32
    # bias + F.relu(x, inplace=True) in f32 on the VPU.
    conv = jnp.maximum(conv + bconv_ref[...], 0.0)
    # F.avg_pool2d(kernel_size=7) on a 7x7 map + .view(N, -1):
    # full-spatial mean, done as an in-kernel reduction (no pooling matmul).
    feat = jnp.sum(conv, axis=0, keepdims=True) * inv_hw          # (1, C_feat) f32
    # classifier: Linear(num_features, num_out). Weights arrive as bf16 (DMA
    # savings); the dot itself is tiny, so run it in f32 for precision.
    out = jnp.dot(feat, wfc_ref[...].astype(jnp.float32),
                  preferred_element_type=jnp.float32) + bfc_ref[...]
    out_ref[...] = out                                            # (1, num_out)


def visual_model_forward(x_nchw, params, *, matmul_dtype=jnp.bfloat16):
    """x_nchw: (N, C_in, H, W) float32. Returns (N, num_out) float32."""
    wconv, bconv, wfc, bfc = (params["wconv"], params["bconv"],
                              params["wfc"], params["bfc"])
    N, C_in, H, W = x_nchw.shape
    KH, KW = 3, 3
    HW = H * W
    K = KH * KW * C_in
    C_feat = wconv.shape[-1]
    num_out = wfc.shape[-1]

    # ---- glue (plain JAX): NCHW -> NHWC, pad, im2col ----
    # TODO(synk): for production backbone shapes, form patches in-kernel
    # (e.g. 9 accumulating shifted matmuls) instead of wrapper-side im2col to
    # avoid the ~9x input re-materialization in HBM; at H=W=7 it is noise.
    x = jnp.transpose(x_nchw, (0, 2, 3, 1))                       # NHWC
    xp = jnp.pad(x, ((0, 0), (1, 1), (1, 1), (0, 0)))
    patches = jnp.concatenate(
        [xp[:, kh:kh + H, kw:kw + W, :] for kh in range(KH) for kw in range(KW)],
        axis=-1,
    ).reshape(N, HW, K).astype(matmul_dtype)                      # (N, HW, 9*C_in)

    wconv_mat = wconv.reshape(K, C_feat).astype(matmul_dtype)     # (9*C_in, C_feat)
    wfc_m = wfc.astype(matmul_dtype)                              # (C_feat, num_out)
    bconv_m = bconv.reshape(1, C_feat).astype(jnp.float32)
    bfc_m = bfc.reshape(1, num_out).astype(jnp.float32)

    itemsize = jnp.dtype(matmul_dtype).itemsize
    cost = pl.CostEstimate(
        flops=2 * N * HW * K * C_feat + 2 * N * C_feat * num_out,
        transcendentals=0,
        bytes_accessed=(patches.size * itemsize
                        + wconv_mat.size * itemsize
                        + wfc_m.size * itemsize
                        + (bconv_m.size + bfc_m.size + N * num_out) * 4),
    )

    kernel = functools.partial(_visual_model_kernel, inv_hw=1.0 / float(HW))

    out = pl.pallas_call(
        kernel,
        out_shape=jax.ShapeDtypeStruct((N, 1, num_out), jnp.float32),
        grid=(N,),
        in_specs=[
            # one sample's patch rows per grid step (batch dim squeezed)
            pl.BlockSpec((None, HW, K), lambda i: (i, 0, 0)),
            # weights / biases: constant block index -> stay resident in VMEM
            pl.BlockSpec((K, C_feat), lambda i: (0, 0)),
            pl.BlockSpec((1, C_feat), lambda i: (0, 0)),
            pl.BlockSpec((C_feat, num_out), lambda i: (0, 0)),
            pl.BlockSpec((1, num_out), lambda i: (0, 0)),
        ],
        out_specs=pl.BlockSpec((None, 1, num_out), lambda i: (i, 0, 0)),
        compiler_params=pltpu.CompilerParams(
            dimension_semantics=("parallel",)),   # v7x: shard batch over 2 TCs
        cost_estimate=cost,
    )(patches, wconv_mat, bconv_m, wfc_m, bfc_m)
    return out.reshape(N, num_out)


def reference_forward(x_nchw, params):
    """Plain-JAX f32 reference mirroring the PyTorch semantics (NCHW conv)."""
    wconv = params["wconv"]                                       # (3, 3, C_in, C_feat)
    w_oihw = jnp.transpose(wconv, (3, 2, 0, 1))                   # (C_out, C_in, kh, kw)
    y = lax.conv_general_dilated(
        x_nchw, w_oihw, window_strides=(1, 1), padding=[(1, 1), (1, 1)],
        dimension_numbers=("NCHW", "OIHW", "NCHW"))
    y = y + params["bconv"][None, :, None, None]
    y = jnp.maximum(y, 0.0)                                       # F.relu
    y = jnp.mean(y, axis=(2, 3))                                  # avg_pool2d(7) + view
    return y @ params["wfc"] + params["bfc"]                      # classifier Linear


def make_params(key, c_in=4, c_feat=32, num_out=8):
    k1, k2, k3, k4 = jax.random.split(key, 4)
    return {
        "wconv": 0.1 * jax.random.normal(k1, (3, 3, c_in, c_feat), jnp.float32),
        "bconv": 0.1 * jax.random.normal(k2, (c_feat,), jnp.float32),
        "wfc": 0.1 * jax.random.normal(k3, (c_feat, num_out), jnp.float32),
        "bfc": 0.1 * jax.random.normal(k4, (num_out,), jnp.float32),
    }


if __name__ == "__main__":
    # 7x7 final feature map so avg_pool2d(kernel_size=7) collapses the spatial
    # dims, exactly as in the backbone head.
    N, C_IN, H, W = 2, 4, 7, 7
    C_FEAT, NUM_OUT = 32, 8

    key = jax.random.PRNGKey(0)
    kx, kp = jax.random.split(key)
    x = jax.random.normal(kx, (N, C_IN, H, W), jnp.float32)
    params = make_params(kp, C_IN, C_FEAT, NUM_OUT)

    out = jax.block_until_ready(visual_model_forward(x, params))

    # Reference mirrors the kernel's bf16 input rounding (activations and
    # matmul weights bf16-rounded, all accumulation/bias/mean in f32), so the
    # remaining difference is accumulation order only -> tight tolerance.
    q = lambda a: a.astype(jnp.bfloat16).astype(jnp.float32)
    params_q = dict(params, wconv=q(params["wconv"]), wfc=q(params["wfc"]))
    ref = jax.block_until_ready(reference_forward(q(x), params_q))

    assert out.shape == (N, NUM_OUT)
    assert jnp.allclose(out, ref, rtol=1e-3, atol=1e-3), (out, ref)

    print("KERNEL_OK")
</pallas_src>

<mosaic_0001>
module attributes {stable_mosaic.version = 11 : i64} {
  func.func @_visual_model_kernel(%arg0: i32, %arg1: memref<1x49x36xbf16, #tpu.memory_space<vmem>>, %arg2: memref<36x32xbf16, #tpu.memory_space<vmem>>, %arg3: memref<1x32xf32, #tpu.memory_space<vmem>>, %arg4: memref<32x8xbf16, #tpu.memory_space<vmem>>, %arg5: memref<1x8xf32, #tpu.memory_space<vmem>>, %arg6: memref<1x1x8xf32, #tpu.memory_space<vmem>>) attributes {dimension_semantics = [#tpu.dimension_semantics<parallel>], iteration_bounds = array<i64: 2>, scalar_prefetch = 0 : i64, scratch_operands = 0 : i64, tpu.core_type = #tpu.core_type<tc>, window_params = [{transform_indices = @transform_0, window_bounds = array<i64: 1, 49, 36>}, {pipeline_mode = #tpu.pipeline_mode<synchronous>, transform_indices = @transform_1, window_bounds = array<i64: 36, 32>}, {pipeline_mode = #tpu.pipeline_mode<synchronous>, transform_indices = @transform_2, window_bounds = array<i64: 1, 32>}, {pipeline_mode = #tpu.pipeline_mode<synchronous>, transform_indices = @transform_3, window_bounds = array<i64: 32, 8>}, {pipeline_mode = #tpu.pipeline_mode<synchronous>, transform_indices = @transform_4, window_bounds = array<i64: 1, 8>}, {transform_indices = @transform_5, window_bounds = array<i64: 1, 1, 8>}]} {
    %c0 = arith.constant 0 : index
    %c0_0 = arith.constant 0 : index
    %c0_1 = arith.constant 0 : index
    %0 = vector.load %arg1[%c0, %c0_0, %c0_1] : memref<1x49x36xbf16, #tpu.memory_space<vmem>>, vector<1x49x36xbf16>
    %1 = vector.shape_cast %0 : vector<1x49x36xbf16> to vector<49x36xbf16>
    %c0_2 = arith.constant 0 : index
    %c0_3 = arith.constant 0 : index
    %2 = vector.load %arg2[%c0_2, %c0_3] : memref<36x32xbf16, #tpu.memory_space<vmem>>, vector<36x32xbf16>
    %cst = arith.constant dense<0.000000e+00> : vector<49x32xf32>
    %3 = tpu.matmul %1, %2, %cst {dimension_numbers = #tpu.dot_dimension_numbers<[1], [0], [0], [1], [0, 0, 1, 1], [], []>} : vector<49x36xbf16>, vector<36x32xbf16>, vector<49x32xf32> -> vector<49x32xf32>
    %c0_4 = arith.constant 0 : index
    %c0_5 = arith.constant 0 : index
    %4 = vector.load %arg3[%c0_4, %c0_5] : memref<1x32xf32, #tpu.memory_space<vmem>>, vector<1x32xf32>
    %5 = vector.broadcast %4 : vector<1x32xf32> to vector<49x32xf32>
    %6 = arith.addf %3, %5 : vector<49x32xf32>
    %cst_6 = arith.constant 0.000000e+00 : f32
    %7 = vector.broadcast %cst_6 : f32 to vector<49x32xf32>
    %8 = arith.maximumf %6, %7 : vector<49x32xf32>
    %cst_7 = arith.constant dense<0.000000e+00> : vector<32xf32>
    %9 = vector.multi_reduction <add>, %8, %cst_7 [0] : vector<49x32xf32> to vector<32xf32>
    %10 = vector.shape_cast %9 : vector<32xf32> to vector<1x32xf32>
    %cst_8 = arith.constant 0.0204081628 : f32
    %11 = vector.broadcast %cst_8 : f32 to vector<1x32xf32>
    %12 = arith.mulf %10, %11 : vector<1x32xf32>
    %c0_9 = arith.constant 0 : index
    %c0_10 = arith.constant 0 : index
    %13 = vector.load %arg4[%c0_9, %c0_10] : memref<32x8xbf16, #tpu.memory_space<vmem>>, vector<32x8xbf16>
    %14 = arith.extf %13 : vector<32x8xbf16> to vector<32x8xf32>
    %cst_11 = arith.constant dense<0.000000e+00> : vector<1x8xf32>
    %15 = tpu.matmul %12, %14, %cst_11 {dimension_numbers = #tpu.dot_dimension_numbers<[1], [0], [0], [1], [0, 0, 1, 1], [], []>} : vector<1x32xf32>, vector<32x8xf32>, vector<1x8xf32> -> vector<1x8xf32>
    %c0_12 = arith.constant 0 : index
    %c0_13 = arith.constant 0 : index
    %16 = vector.load %arg5[%c0_12, %c0_13] : memref<1x8xf32, #tpu.memory_space<vmem>>, vector<1x8xf32>
    %17 = arith.addf %15, %16 : vector<1x8xf32>
    %c0_14 = arith.constant 0 : index
    %c0_15 = arith.constant 0 : index
    %c0_16 = arith.constant 0 : index
    %18 = vector.load %arg6[%c0_14, %c0_15, %c0_16] : memref<1x1x8xf32, #tpu.memory_space<vmem>>, vector<1x1x8xf32>
    %19 = vector.shape_cast %18 : vector<1x1x8xf32> to vector<1x8xf32>
    %20 = vector.shape_cast %17 : vector<1x8xf32> to vector<1x1x8xf32>
    tpu.vector_store %arg6[%c0_14, %c0_15, %c0_16], %20 {strides = array<i32>} : memref<1x1x8xf32, #tpu.memory_space<vmem>>, vector<1x1x8xf32>,
    return
  }
  func.func @transform_0(%arg0: i32) -> (i32, i32, i32) {
    %c0_i32 = arith.constant 0 : i32
    %c0_i32_0 = arith.constant 0 : i32
    %c0_i32_1 = arith.constant 0 : i32
    return %arg0, %c0_i32, %c0_i32_0 : i32, i32, i32
  }
  func.func @transform_1(%arg0: i32) -> (i32, i32) {
    %c0_i32 = arith.constant 0 : i32
    %c0_i32_0 = arith.constant 0 : i32
    %c0_i32_1 = arith.constant 0 : i32
    return %c0_i32, %c0_i32_0 : i32, i32
  }
  func.func @transform_2(%arg0: i32) -> (i32, i32) {
    %c0_i32 = arith.constant 0 : i32
    %c0_i32_0 = arith.constant 0 : i32
    %c0_i32_1 = arith.constant 0 : i32
    return %c0_i32, %c0_i32_0 : i32, i32
  }
  func.func @transform_3(%arg0: i32) -> (i32, i32) {
    %c0_i32 = arith.constant 0 : i32
    %c0_i32_0 = arith.constant 0 : i32
    %c0_i32_1 = arith.constant 0 : i32
    return %c0_i32, %c0_i32_0 : i32, i32
  }
  func.func @transform_4(%arg0: i32) -> (i32, i32) {
    %c0_i32 = arith.constant 0 : i32
    %c0_i32_0 = arith.constant 0 : i32
    %c0_i32_1 = arith.constant 0 : i32
    return %c0_i32, %c0_i32_0 : i32, i32
  }
  func.func @transform_5(%arg0: i32) -> (i32, i32, i32) {
    %c0_i32 = arith.constant 0 : i32
    %c0_i32_0 = arith.constant 0 : i32
    %c0_i32_1 = arith.constant 0 : i32
    return %arg0, %c0_i32, %c0_i32_0 : i32, i32, i32
  }
}

</mosaic_0001>

<bundles_post_ra>
// kernel: tpu_custom_call.1
= control target key start
LH: loop header
LB: loop body
LE: loop exit
PB: predicated region body
PF: predicated region fallthrough
CT: control target
= control target key end

     0   :  { %10 = vsyncpa [#allocation3], 0  ;;  %s894_s0 = inlined_call_operand.vmem [shape: bf16[2,49,36], index: 0, kind: input, shape index: {}]   ;;  %s895_s1 = inlined_call_operand.vmem [shape: bf16[36,32], index: 1, kind: input, shape index: {}]   ;;  %s896_s2 = inlined_call_operand.vmem [shape: f32[1,32], index: 2, kind: input, shape index: {}]   ;;  %s897_s3 = inlined_call_operand.vmem [shape: bf16[32,8], index: 3, kind: input, shape index: {}]   ;;  %s898_s4 = inlined_call_operand.vmem [shape: f32[1,8], index: 4, kind: input, shape index: {}]   ;;  %s899_s5 = inlined_call_operand.hbm [shape: f32[2,1,8], index: 5, kind: output, shape index: {}]  }
   0x1   :  { %12 = vsyncpa [#allocation3 + $0x1], 0  ;;  %s766_s18 = smov 0   ;;  %s768_s19 = smov 0  }
   0x2   :  { %s770_s20 = smov 0   ;;  %s772_s21 = smov 0  }
   0x3 LB: > { %s787_s22 = sadd.s32 4294967295, %s730_s21   ;;  %s537_s23 = sadd.s32 4294967294, %s730_s21   ;;  %s730_s21 = sphi %s772_s21, %s905_s21   ;;  %s726_s20 = sphi %s770_s20, %s904_s20   ;;  %s722_s19 = sphi %s768_s19, %s903_s19   ;;  %s718_s18 = sphi %s766_s18, %s902_s18  }
   0x4   : > { %s791_s24 = sadd.s32 1, %s730_s21   ;;  %s135_s25 = sadd.s32 1, %s726_s20 }
   0x5   : > { %s132_s26 = ssub.s32 %s730_s21, %s791_s24  ;;  %p145_p0 = scmp.ne.s32.totalorder %s726_s20, %s722_s19 }
   0x6   : > { %p133_p1 = scmp.eq.s32.totalorder %s132_s26, 0  ;;  %p146_p2 = scmp.eq.s32.totalorder %s787_s22, 1 }
   0x7   : > { %p151_p3 = scmp.ne.s32.totalorder %s722_s19, %s718_s18  ;;  %p152_p4 = scmp.eq.s32.totalorder %s537_s23, 1 }
   0x8   : > { %s802_s27 = scalar_select %p133_p1, %s726_s20, %s135_s25  }
   0x9   : > { %p804_p5 = por %p146_p2, %p145_p0  ;;  %p808_p6 = por %p152_p4, %p151_p3 }
   0xa   : > { %p540_p7 = scmp.ge.s32.totalorder %s730_s21, 1  ;;  %p190_p8 = scmp.lt.s32.totalorder %s730_s21, 3 }
   0xc   : > { %p191_p9 = pnand %p540_p7, %p190_p8 }
   0xd   : > { %v661_v0 = vld [vmem:[%s895_s1] sm:$0xff] (!%p191_p9)   ;;  %v662_v1 = vld [vmem:[%s895_s1 + $0x8] sm:$0xff] (!%p191_p9)   ;;  %p217_p10 = scmp.lt.s32.totalorder (!%p191_p9), %s787_s22, 1  ;;  %v663_v2 = vld [vmem:[%s895_s1 + $0x10] ss:$0 sps:$4 sm:$0x33] (!%p191_p9)  }
   0xe   : > { %194 = sbr.rel (%p191_p9) target bundleno = 502 (0x1f6), region = 40  ;;  %579 = vmatprep.subr.bf16.mxu0 (!%p191_p9), %v661_v0  ;;  %610 = vmatprep.subr.bf16.mxu1 (!%p191_p9), %v661_v0  ;;  %vm288_vm0 = vcmask (!%p191_p9), 1041408   ;;  %vm275_vm1 = vcmask (!%p191_p9), 293888   ;;  %v732_v8 = vmov (!%p191_p9), 0.0|0.0   ;;  %v559_v9 = vld [vmem:[%s897_s3] sm:$0xff] (!%p191_p9)   ;;  %v566_v10 = vld [vmem:[%s897_s3 + $0x8] sm:$0xff] (!%p191_p9)  }
   0xf   : > { %580 = vmatpush3.bf16.msra.mxu0 (!%p191_p9), %v661_v0  ;;  %613 = vmatpush3.bf16.msra.mxu1 (!%p191_p9), %v661_v0  ;;  %v290_v3 = vsel (!%p191_p9), %vm288_vm0, %v663_v2, 0  ;;  %vm733_vm2 = vmmov (!%p191_p9), 0   ;;  %v734_v11 = vmov (!%p191_p9), 0.0   ;;  %v542_v12 = vld [vmem:[%s896_s2] ss:$0 sm:$0xff] (!%p191_p9)  ;;  %vm363_vm3 = vcmask (!%p191_p9), 261120  }
  0x10   : > { %581 = vmatprep.subr.bf16.mxu0 (!%p191_p9), %v662_v1  ;;  %611 = vmatprep.subr.bf16.mxu1 (!%p191_p9), %v662_v1  ;;  %vm375_vm4 = vcmask (!%p191_p9), 253952   ;;  %s215_s6 = sand.u32 (!%p191_p9), 1, %s722_s19   ;;  %v393_v55 = vld [vmem:[%s898_s4] sm:$0x1] (!%p191_p9)  ;;  %vm467_vm5 = vcmask (!%p191_p9), 57344  }
  0x11   : > { %s216_s10 = scalar_lea.vmem (!%p191_p9), [#allocation2], %s215_s6 }
  0x12   : > { %s482_s11 = sshll.u32 (!%p191_p9), %s216_s10, 4  ;;  %s854_s11 = int_to_ptr.vmem [resolvable:$true] %s482_s11 }
  0x13   : > { %582 = vmatpush3.bf16.msra.mxu0 (!%p191_p9), %v662_v1  ;;  %614 = vmatpush3.bf16.msra.mxu1 (!%p191_p9), %v662_v1  ;;  %s668_s16 = scalar_lea.vmem (!%p191_p9), %s854_s11, 16 }
  0x14   : > { %616 = vmatprep.subr.msk.bf16.mxu0 (!%p191_p9), %vm288_vm0, %v663_v2  ;;  %617 = vmatprep.subr.msk.bf16.mxu1 (!%p191_p9), %vm288_vm0, %v663_v2  ;;  %p669_p11 = scmp.ne.s32.totalorder (!%p191_p9), %s854_s11, %s668_s16 }
  0x15   : > { %s218_s9 = scalar_select %p217_p10, %s787_s22, 1 }
  0x16   : > { %p670_p12 = pnand %p669_p11, %p804_p5 }
  0x17   : > { %s618_s12 = smul.u32 28, %s218_s9  ;;  %584 = vmatpush3.bf16.msra.mxu0 %v290_v3  ;;  %615 = vmatpush3.bf16.msra.mxu1 %v290_v3  ;;  %s555_s9 = sshll.u32 %s787_s22, 4 }
  0x18   : > { %604 = vmatprep.subr.bf16.mxu1 %v732_v8  ;;  %s852_s14 = scalar_lea.hbm %s899_s5, %s555_s9  ;;  %p671_p13 = pneg %p670_p12 }
  0x19   : > { %s221_s15 = scalar_lea.vmem %s894_s0, %s618_s12  ;;  %s735_s22 = smov [#allocation2]  }
  0x1a   : > { %v664_v4 = vld [vmem:[%s221_s15] sm:$0xff]   ;;  %v665_v5 = vld [vmem:[%s221_s15 + $0x8] sm:$0xff]   ;;  %v666_v6 = vld [vmem:[%s221_s15 + $0x10] sm:$0xff]   ;;  %s672_s17 = sshll.u32 %s735_s22, 4  ;;  %s673_s17 = int_to_ptr.vmem [resolvable:$false] %s672_s17 }
  0x1b   : > { %585 = vmatprep.mubr.msk.bf16.mxu0 %vm275_vm1, %v664_v4  ;;  %v667_v7 = vld [vmem:[%s221_s15 + $0x18] ss:$0 sps:$4 sm:$0x11]   ;;  %589 = vmatprep.mubr.msk.bf16.mxu1 %vm275_vm1, %v666_v6  ;;  %s470_s15 = scalar_lea.sflag [#allocation3], %s215_s6  ;;  %s674_s23 = scalar_lea.vmem %s673_s17, 32 }
  0x1c   : > { %586 = vmatmul.mubr.msk.bf16.vlgmr.msra.gmra.mrb[0].mxu0 %vm275_vm1, %v665_v5  ;;  %590 = vmatmul.mubr.msk.bf16.vlgmr.msra.gmra.mrb[0].mxu1 %vm275_vm1, %v667_v7  ;;  %p675_p0 = scmp.lt.s32.totalorder %s854_s11, %s673_s17  ;;  %p676_p1 = scmp.lt.s32.totalorder %s674_s23, %s668_s16 }
  0x1d   : > { %606 = vmatpush3.bf16.msra.mxu1 %v559_v9  ;;  %601 = vmatprep.mubr.msk.f32.mxu1 %vm733_vm2, %v734_v11 }
  0x1e   : > { %607 = vmatprep.subr.bf16.mxu1 %v732_v8  ;;  %p677_p2 = por %p676_p1, %p675_p0 }
  0x20   : > { %p678_p3 = pnand %p677_p2, %p671_p13 }
  0x21   : > { %609 = vmatpush3.bf16.msra.mxu1 %v566_v10 }
  0xef   : > { %v587_v13 = vpop.f32.mrb[0].mxu0  ;;  %v591_v14 = vpop.f32.mrb[0].mxu1 }
  0xf0   : > { %v326_v15 = vpop.f32.mrb[1].mxu0  ;;  %v342_v16 = vpop.f32.mrb[1].mxu1  ;;  %v335_v17 = vadd.f32 %v587_v13, %v542_v12  ;;  %v351_v36 = vadd.f32 %v591_v14, %v542_v12 }
  0xf1   : > { %v327_v18 = vadd.f32 %v542_v12, %v326_v15  ;;  %v588_v19 = vpop.f32.mrb[2].mxu0  ;;  %v592_v20 = vpop.f32.mrb[2].mxu1  ;;  %v343_v22 = vadd.f32 %v542_v12, %v342_v16 }
  0xf2   : > { %v329_v21 = vpop.f32.mrb[3].mxu0  ;;  %v345_v23 = vpop.f32.mrb[3].mxu1  ;;  %v338_v25 = vadd.f32 %v588_v19, %v542_v12  ;;  %v358_v27 = vmax.f32 %v335_v17, 0.0  ;;  %v362_v42 = vmax.f32 %v351_v36, 0.0 }
  0xf3   : > { %v356_v24 = vmax.f32 %v327_v18, 0.0  ;;  %v330_v26 = vadd.f32 %v542_v12, %v329_v21  ;;  %v360_v29 = vmax.f32 %v343_v22, 0.0  ;;  %v346_v33 = vadd.f32 %v542_v12, %v345_v23 }
  0xf4   : > { %v359_v31 = vmax.f32 %v338_v25, 0.0  ;;  %v367_v35 = vsel %vm363_vm3, %v358_v27, 0.0  ;;  %v376_v46 = vsel %vm375_vm4, %v362_v42, 0.0 }
  0xf5   : > { %v357_v28 = vmax.f32 %v330_v26, 0.0  ;;  %v364_v30 = vsel %vm363_vm3, %v356_v24, 0.0  ;;  %v371_v39 = vsel %vm363_vm3, %v360_v29, 0.0  ;;  %v361_v40 = vmax.f32 %v346_v33, 0.0 }
  0xf6   : > { %v369_v38 = vsel %vm363_vm3, %v359_v31, 0.0 }
  0xf7   : > { %v365_v32 = vsel %vm363_vm3, %v357_v28, 0.0  ;;  %v373_v44 = vsel %vm363_vm3, %v361_v40, 0.0 }
  0xf8   : > { %v366_v34 = vadd.f32 %v365_v32, %v364_v30 }
  0xfa   : > { %v368_v37 = vadd.f32 %v367_v35, %v366_v34 }
  0xfc   : > { %v370_v41 = vadd.f32 %v369_v38, %v368_v37 }
  0xfe   : > { %v372_v43 = vadd.f32 %v371_v39, %v370_v41 }
 0x100   : > { %v374_v45 = vadd.f32 %v373_v44, %v372_v43 }
 0x102   : > { %v377_v47 = vadd.f32 %v376_v46, %v374_v45 }
 0x104   : > { %v378_v48 = vrot.slane %v377_v47, 4 }
 0x106   : > { %v379_v49 = vadd.f32 %v378_v48, %v377_v47 }
 0x108   : > { %v380_v50 = vrot.slane %v379_v49, 2 }
 0x10a   : > { %v381_v51 = vadd.f32 %v380_v50, %v379_v49 }
 0x10c   : > { %v382_v52 = vrot.slane %v381_v51, 1 }
 0x10e   : > { %v383_v53 = vadd.f32 %v382_v52, %v381_v51 }
 0x110   : > { %v384_v54 = vmul.f32 0.020408163, %v383_v53 }
 0x112   : > { %602 = vmatmul.mubr.msk.f32.vlgmr.msra.gmra.mrb[4].mxu1 %vm363_vm3, %v384_v54 }
 0x1e5   : > { %v463_v56 = vpop.f32.mrb[4].mxu1 }
 0x1e6   : > { %v464_v57 = vadd.f32 %v463_v56, %v393_v55  ;;  %v603_v58 = vpop.f32.mrb[5].mxu1 }
 0x1e8   : > { %468 = vst.msk [vmem:[%s216_s10] sm:$0x1] %vm467_vm5, %v464_v57 }
 0x1e9   : > { %681 = shalt.err (!%p678_p3)
}
 0x1ea   : > { %s682_s25 = scalar_lea.hbm %s852_s14, 16  ;;  %s686_s6 = scalar_lea.hbm %s899_s5, 32 }
 0x1eb   : > { %p683_p4 = scmp.ne.s32.totalorder %s852_s14, %s682_s25  ;;  %p687_p9 = scmp.lt.u32.totalorder %s852_s14, %s899_s5 }
 0x1ec   : > { %p688_p10 = scmp.lt.u32.totalorder %s686_s6, %s682_s25  ;;  %p690_p12 = scmp.lt.u32.totalorder %s682_s25, %s852_s14 }
 0x1ed   : > { %p684_p7 = pnand %p683_p4, %p804_p5 }
 0x1ee   : > { %p689_p11 = por %p688_p10, %p687_p9 }
 0x1ef   : > { %p685_p8 = pneg %p684_p7 }
 0x1f0   : > { %p691_p13 = por %p690_p12, %p689_p11 }
 0x1f2   : > { %p692_p0 = pnand %p691_p13, %p685_p8 }
 0x1f4   : > { %695 = shalt.err (!%p692_p0)
}
 0x1f5   : > { %619 = dma.vmem_to_hbm [thread:$0]  (%p804_p5), %s854_s11, 16, %s852_s14, %s470_s15  }
 0x1f6 PF: > { %p625_p1 = scmp.ge.s32.totalorder %s730_s21, 2  ;;  %s494_s9 = sand.u32 1, %s718_s18  }
 0x1f7   : > { %s495_s10 = scalar_lea.sflag [#allocation3], %s494_s9 }
 0x1f8   : > { %p622_p2 = pnand %p625_p1, %p808_p6 }
 0x1fa   : > { %713 = dma.done.wait (!%p622_p2), %s495_s10, 16  }
 0x1fb   : > { %715 = vsyncadd (!%p622_p2), %s495_s10, 4294967280  ;;  %p15_p3 = scmp.ge.s32.totalorder %s791_s24, 4   ;;  %s902_s18 = smov %s722_s19 }
 0x1fc   : > { %s903_s19 = smov %s726_s20  ;;  %s904_s20 = smov %s802_s27 }
 0x1fd   : > { %s905_s21 = smov %s791_s24  ;;  %17 = sbr.rel (!%p15_p3) target bundleno = 3 (0x3), region = 75 }
 0x204   :  { %499 = vsyncpa [#allocation3], 1 }
 0x205   :  { %501 = vsyncpa [#allocation3 + $0x1], 1 }

</bundles_post_ra>
